<compile_context>
chip_gen: v6e
topology: v6e:2x2x1
jax: 0.10.0
libtpu: 0.0.40
codegen_flags: <defaults>
</compile_context>

<pallas_src>
import functools

import jax
import jax.numpy as jnp
from jax.experimental import pallas as pl
from jax.experimental.pallas import tpu as pltpu


def _s4_layer_kernel(x_ref, gamma_ref, beta_ref, t_ref, w_ref, b_ref, out_ref, *, eps):
    # x_ref:    (1, H, L)  original input block (also used for the residual)
    # gamma/beta: (H, 1)   LayerNorm affine params
    # t_ref:    (L, H, L)  Toeplitz conv weight; T[j, h, l] = contribution of input
    #                      position j to output position l for channel h (D skip folded
    #                      onto the j == l diagonal)
    # w_ref:    (H, H)     pointwise output linear weight, b_ref: (H, 1) bias
    # out_ref:  (1, H, L)
    x = x_ref[0]                                             # (H, L)
    _, L = x.shape

    # ---- LayerNorm over the channel (d_model) axis --------------------------------
    mean = jnp.mean(x, axis=0, keepdims=True)                # (1, L)
    centred = x - mean
    var = jnp.mean(centred * centred, axis=0, keepdims=True) # (1, L)
    z = centred * jax.lax.rsqrt(var + eps)                   # (H, L)
    z = z * gamma_ref[...] + beta_ref[...]                   # affine, (H, 1) broadcast

    # ---- bidirectional depthwise SSM convolution + D skip --------------------------
    # y[h, l] = sum_j z[h, j] * T[j, h, l]   (exact time-domain form of the FFT conv)
    y = jnp.zeros_like(z)
    for j in range(L):                                       # static length, unrolled
        y = y + z[:, j:j + 1] * t_ref[j]                     # (H, 1) * (H, L) FMA (VPU)

    # ---- GELU + pointwise output linear (postact=None -> plain linear) -------------
    # TODO(synk): PyTorch nn.GELU defaults to the exact erf form; the tanh approximation
    # is used here (Mosaic-safe transcendental path), difference < 1e-3.
    y = jax.nn.gelu(y, approximate=True)
    v = jnp.dot(w_ref[...], y,
                preferred_element_type=jnp.float32,
                precision=jax.lax.Precision.HIGHEST) + b_ref[...]   # (H, L)

    # ---- residual -------------------------------------------------------------------
    out_ref[0] = v + x


def _build_conv_weight(k_fwd, k_bwd, D):
    """Toeplitz weight T[j, h, l] for the bidirectional depthwise convolution.

    T[j, h, l] = k_fwd[h, l - j]      if l >= j   (causal / forward direction)
               = k_bwd[h, j - l - 1]  if l <  j   (anti-causal / backward direction)
    with the D skip folded onto the diagonal (j == l).
    This is pure weight preprocessing (independent of the activations).
    """
    H, L = k_fwd.shape
    jj = jnp.arange(L)[:, None]                   # (L, 1)  input position j
    ll = jnp.arange(L)[None, :]                   # (1, L)  output position l
    diff = ll - jj                                # (L, L)  = l - j
    fwd_idx = jnp.clip(diff, 0, L - 1)
    bwd_idx = jnp.clip(-diff - 1, 0, L - 1)
    t_fwd = jnp.transpose(k_fwd[:, fwd_idx], (1, 0, 2))   # (L, H, L)
    t_bwd = jnp.transpose(k_bwd[:, bwd_idx], (1, 0, 2))   # (L, H, L)
    T = jnp.where((diff >= 0)[:, None, :], t_fwd, t_bwd)
    T = T + (diff == 0)[:, None, :].astype(T.dtype) * D[None, :, None]
    return T


def s4_layer_forward(x, ln_gamma, ln_beta, k_fwd, k_bwd, D, w_out, b_out, *, eps=1e-5):
    """Pallas equivalent of S4Layer(d_model).forward(x)[0].  x: (B, d_model, L)."""
    B, H, L = x.shape
    f32 = jnp.float32
    T = _build_conv_weight(k_fwd.astype(f32), k_bwd.astype(f32), D.astype(f32))  # (L,H,L)
    gamma = ln_gamma.reshape(H, 1).astype(f32)
    beta = ln_beta.reshape(H, 1).astype(f32)
    bias = b_out.reshape(H, 1).astype(f32)

    kernel = functools.partial(_s4_layer_kernel, eps=eps)
    out = pl.pallas_call(
        kernel,
        out_shape=jax.ShapeDtypeStruct((B, H, L), f32),
        grid=(B,),
        in_specs=[
            pl.BlockSpec((1, H, L), lambda b: (b, 0, 0)),    # x
            pl.BlockSpec((H, 1), lambda b: (0, 0)),          # LN gamma
            pl.BlockSpec((H, 1), lambda b: (0, 0)),          # LN beta
            pl.BlockSpec((L, H, L), lambda b: (0, 0, 0)),    # Toeplitz conv weight
            pl.BlockSpec((H, H), lambda b: (0, 0)),          # output linear weight
            pl.BlockSpec((H, 1), lambda b: (0, 0)),          # output linear bias
        ],
        out_specs=pl.BlockSpec((1, H, L), lambda b: (b, 0, 0)),
        compiler_params=pltpu.CompilerParams(dimension_semantics=("parallel",)),
    )(x.astype(f32), gamma, beta, T, w_out.astype(f32), bias)
    # The PyTorch module returns (x, None); the trivial state is dropped here.
    return out


def _reference(x, ln_gamma, ln_beta, k_fwd, k_bwd, D, w_out, b_out, eps=1e-5):
    """Pure-JAX mirror of the PyTorch forward (FFT convolution, as in the original S4)."""
    B, H, L = x.shape
    # pre-LayerNorm over d_model
    xt = jnp.transpose(x, (0, 2, 1))                          # (B, L, H)
    mean = xt.mean(-1, keepdims=True)
    var = ((xt - mean) ** 2).mean(-1, keepdims=True)
    z = (xt - mean) / jnp.sqrt(var + eps) * ln_gamma + ln_beta
    z = jnp.transpose(z, (0, 2, 1))                           # (B, H, L)
    # bidirectional FFT convolution (same as torch.fft.rfft/irfft path)
    zero = jnp.zeros_like(k_fwd)
    k_full = (jnp.concatenate([k_fwd, zero], axis=-1)
              + jnp.concatenate([zero, k_bwd[:, ::-1]], axis=-1))   # (H, 2L)
    kf = jnp.fft.rfft(k_full, n=2 * L)
    zf = jnp.fft.rfft(z, n=2 * L)
    y = jnp.fft.irfft(zf * kf[None], n=2 * L)[..., :L]
    y = y + D[None, :, None] * z                              # D skip
    y = jax.nn.gelu(y, approximate=True)
    v = jnp.einsum('oh,bhl->bol', w_out, y,
                   precision=jax.lax.Precision.HIGHEST) + b_out[None, :, None]
    return v + x


if __name__ == "__main__":
    B, H, L = 2, 32, 16       # batch, d_model, sequence length

    key = jax.random.PRNGKey(0)
    kx, kg, kb, kk0, kk1, kd, kw, kbo = jax.random.split(key, 8)
    x = jax.random.normal(kx, (B, H, L), jnp.float32)
    ln_gamma = 1.0 + 0.1 * jax.random.normal(kg, (H,), jnp.float32)
    ln_beta = 0.1 * jax.random.normal(kb, (H,), jnp.float32)
    # materialized SSM convolution kernels (stand-ins for HippoSSKernel(L) output)
    k_fwd = jax.random.normal(kk0, (H, L), jnp.float32) / L
    k_bwd = jax.random.normal(kk1, (H, L), jnp.float32) / L
    D = jax.random.normal(kd, (H,), jnp.float32)
    w_out = jax.random.normal(kw, (H, H), jnp.float32) / jnp.sqrt(H)
    b_out = 0.1 * jax.random.normal(kbo, (H,), jnp.float32)

    out = s4_layer_forward(x, ln_gamma, ln_beta, k_fwd, k_bwd, D, w_out, b_out)
    out = jax.block_until_ready(out)

    ref = _reference(x, ln_gamma, ln_beta, k_fwd, k_bwd, D, w_out, b_out)
    assert out.shape == (B, H, L), out.shape
    assert out.dtype == jnp.float32, out.dtype
    err = float(jnp.max(jnp.abs(out - ref)))
    assert jnp.allclose(out, ref, atol=1e-3, rtol=1e-3), f"mismatch vs reference, max|err|={err}"

    print("KERNEL_OK")
</pallas_src>

<mosaic_0001>
module attributes {stable_mosaic.version = 11 : i64} {
  func.func @_s4_layer_kernel(%arg0: i32, %arg1: memref<1x32x16xf32, #tpu.memory_space<vmem>>, %arg2: memref<32x1xf32, #tpu.memory_space<vmem>>, %arg3: memref<32x1xf32, #tpu.memory_space<vmem>>, %arg4: memref<16x32x16xf32, #tpu.memory_space<vmem>>, %arg5: memref<32x32xf32, #tpu.memory_space<vmem>>, %arg6: memref<32x1xf32, #tpu.memory_space<vmem>>, %arg7: memref<1x32x16xf32, #tpu.memory_space<vmem>>) attributes {dimension_semantics = [#tpu.dimension_semantics<parallel>], iteration_bounds = array<i64: 2>, scalar_prefetch = 0 : i64, scratch_operands = 0 : i64, tpu.core_type = #tpu.core_type<tc>, window_params = [{transform_indices = @transform_0, window_bounds = array<i64: 1, 32, 16>}, {pipeline_mode = #tpu.pipeline_mode<synchronous>, transform_indices = @transform_1, window_bounds = array<i64: 32, 1>}, {pipeline_mode = #tpu.pipeline_mode<synchronous>, transform_indices = @transform_2, window_bounds = array<i64: 32, 1>}, {pipeline_mode = #tpu.pipeline_mode<synchronous>, transform_indices = @transform_3, window_bounds = array<i64: 16, 32, 16>}, {pipeline_mode = #tpu.pipeline_mode<synchronous>, transform_indices = @transform_4, window_bounds = array<i64: 32, 32>}, {pipeline_mode = #tpu.pipeline_mode<synchronous>, transform_indices = @transform_5, window_bounds = array<i64: 32, 1>}, {transform_indices = @transform_6, window_bounds = array<i64: 1, 32, 16>}]} {
    %c0 = arith.constant 0 : index
    %c0_0 = arith.constant 0 : index
    %c0_1 = arith.constant 0 : index
    %0 = vector.load %arg1[%c0, %c0_0, %c0_1] : memref<1x32x16xf32, #tpu.memory_space<vmem>>, vector<1x32x16xf32>
    %1 = vector.shape_cast %0 : vector<1x32x16xf32> to vector<32x16xf32>
    %cst = arith.constant dense<0.000000e+00> : vector<16xf32>
    %2 = vector.multi_reduction <add>, %1, %cst [0] : vector<32x16xf32> to vector<16xf32>
    %3 = vector.shape_cast %2 : vector<16xf32> to vector<1x16xf32>
    %cst_2 = arith.constant 3.200000e+01 : f32
    %4 = vector.broadcast %cst_2 : f32 to vector<1x16xf32>
    %5 = arith.divf %3, %4 : vector<1x16xf32>
    %6 = vector.broadcast %5 : vector<1x16xf32> to vector<32x16xf32>
    %7 = arith.subf %1, %6 : vector<32x16xf32>
    %8 = arith.mulf %7, %7 : vector<32x16xf32>
    %cst_3 = arith.constant dense<0.000000e+00> : vector<16xf32>
    %9 = vector.multi_reduction <add>, %8, %cst_3 [0] : vector<32x16xf32> to vector<16xf32>
    %10 = vector.shape_cast %9 : vector<16xf32> to vector<1x16xf32>
    %cst_4 = arith.constant 3.200000e+01 : f32
    %11 = vector.broadcast %cst_4 : f32 to vector<1x16xf32>
    %12 = arith.divf %10, %11 : vector<1x16xf32>
    %cst_5 = arith.constant 9.99999974E-6 : f32
    %13 = vector.broadcast %cst_5 : f32 to vector<1x16xf32>
    %14 = arith.addf %12, %13 : vector<1x16xf32>
    %15 = math.rsqrt %14 : vector<1x16xf32>
    %16 = vector.broadcast %15 : vector<1x16xf32> to vector<32x16xf32>
    %17 = arith.mulf %7, %16 : vector<32x16xf32>
    %c0_6 = arith.constant 0 : index
    %c0_7 = arith.constant 0 : index
    %18 = vector.load %arg2[%c0_6, %c0_7] : memref<32x1xf32, #tpu.memory_space<vmem>>, vector<32x1xf32>
    %19 = vector.broadcast %18 : vector<32x1xf32> to vector<32x16xf32>
    %20 = arith.mulf %17, %19 : vector<32x16xf32>
    %c0_8 = arith.constant 0 : index
    %c0_9 = arith.constant 0 : index
    %21 = vector.load %arg3[%c0_8, %c0_9] : memref<32x1xf32, #tpu.memory_space<vmem>>, vector<32x1xf32>
    %22 = vector.broadcast %21 : vector<32x1xf32> to vector<32x16xf32>
    %23 = arith.addf %20, %22 : vector<32x16xf32>
    %cst_10 = arith.constant 0.000000e+00 : f32
    %24 = vector.broadcast %cst_10 : f32 to vector<32x16xf32>
    %25 = vector.extract_strided_slice %23 {offsets = [0, 0], sizes = [32, 1], strides = [1, 1]} : vector<32x16xf32> to vector<32x1xf32>
    %c0_11 = arith.constant 0 : index
    %c0_12 = arith.constant 0 : index
    %c0_13 = arith.constant 0 : index
    %26 = vector.load %arg4[%c0_11, %c0_12, %c0_13] : memref<16x32x16xf32, #tpu.memory_space<vmem>>, vector<1x32x16xf32>
    %27 = vector.shape_cast %26 : vector<1x32x16xf32> to vector<32x16xf32>
    %28 = vector.broadcast %25 : vector<32x1xf32> to vector<32x16xf32>
    %29 = arith.mulf %28, %27 : vector<32x16xf32>
    %30 = arith.addf %24, %29 : vector<32x16xf32>
    %31 = vector.extract_strided_slice %23 {offsets = [0, 1], sizes = [32, 1], strides = [1, 1]} : vector<32x16xf32> to vector<32x1xf32>
    %c1 = arith.constant 1 : index
    %c0_14 = arith.constant 0 : index
    %c0_15 = arith.constant 0 : index
    %32 = vector.load %arg4[%c1, %c0_14, %c0_15] : memref<16x32x16xf32, #tpu.memory_space<vmem>>, vector<1x32x16xf32>
    %33 = vector.shape_cast %32 : vector<1x32x16xf32> to vector<32x16xf32>
    %34 = vector.broadcast %31 : vector<32x1xf32> to vector<32x16xf32>
    %35 = arith.mulf %34, %33 : vector<32x16xf32>
    %36 = arith.addf %30, %35 : vector<32x16xf32>
    %37 = vector.extract_strided_slice %23 {offsets = [0, 2], sizes = [32, 1], strides = [1, 1]} : vector<32x16xf32> to vector<32x1xf32>
    %c2 = arith.constant 2 : index
    %c0_16 = arith.constant 0 : index
    %c0_17 = arith.constant 0 : index
    %38 = vector.load %arg4[%c2, %c0_16, %c0_17] : memref<16x32x16xf32, #tpu.memory_space<vmem>>, vector<1x32x16xf32>
    %39 = vector.shape_cast %38 : vector<1x32x16xf32> to vector<32x16xf32>
    %40 = vector.broadcast %37 : vector<32x1xf32> to vector<32x16xf32>
    %41 = arith.mulf %40, %39 : vector<32x16xf32>
    %42 = arith.addf %36, %41 : vector<32x16xf32>
    %43 = vector.extract_strided_slice %23 {offsets = [0, 3], sizes = [32, 1], strides = [1, 1]} : vector<32x16xf32> to vector<32x1xf32>
    %c3 = arith.constant 3 : index
    %c0_18 = arith.constant 0 : index
    %c0_19 = arith.constant 0 : index
    %44 = vector.load %arg4[%c3, %c0_18, %c0_19] : memref<16x32x16xf32, #tpu.memory_space<vmem>>, vector<1x32x16xf32>
    %45 = vector.shape_cast %44 : vector<1x32x16xf32> to vector<32x16xf32>
    %46 = vector.broadcast %43 : vector<32x1xf32> to vector<32x16xf32>
    %47 = arith.mulf %46, %45 : vector<32x16xf32>
    %48 = arith.addf %42, %47 : vector<32x16xf32>
    %49 = vector.extract_strided_slice %23 {offsets = [0, 4], sizes = [32, 1], strides = [1, 1]} : vector<32x16xf32> to vector<32x1xf32>
    %c4 = arith.constant 4 : index
    %c0_20 = arith.constant 0 : index
    %c0_21 = arith.constant 0 : index
    %50 = vector.load %arg4[%c4, %c0_20, %c0_21] : memref<16x32x16xf32, #tpu.memory_space<vmem>>, vector<1x32x16xf32>
    %51 = vector.shape_cast %50 : vector<1x32x16xf32> to vector<32x16xf32>
    %52 = vector.broadcast %49 : vector<32x1xf32> to vector<32x16xf32>
    %53 = arith.mulf %52, %51 : vector<32x16xf32>
    %54 = arith.addf %48, %53 : vector<32x16xf32>
    %55 = vector.extract_strided_slice %23 {offsets = [0, 5], sizes = [32, 1], strides = [1, 1]} : vector<32x16xf32> to vector<32x1xf32>
    %c5 = arith.constant 5 : index
    %c0_22 = arith.constant 0 : index
    %c0_23 = arith.constant 0 : index
    %56 = vector.load %arg4[%c5, %c0_22, %c0_23] : memref<16x32x16xf32, #tpu.memory_space<vmem>>, vector<1x32x16xf32>
    %57 = vector.shape_cast %56 : vector<1x32x16xf32> to vector<32x16xf32>
    %58 = vector.broadcast %55 : vector<32x1xf32> to vector<32x16xf32>
    %59 = arith.mulf %58, %57 : vector<32x16xf32>
    %60 = arith.addf %54, %59 : vector<32x16xf32>
    %61 = vector.extract_strided_slice %23 {offsets = [0, 6], sizes = [32, 1], strides = [1, 1]} : vector<32x16xf32> to vector<32x1xf32>
    %c6 = arith.constant 6 : index
    %c0_24 = arith.constant 0 : index
    %c0_25 = arith.constant 0 : index
    %62 = vector.load %arg4[%c6, %c0_24, %c0_25] : memref<16x32x16xf32, #tpu.memory_space<vmem>>, vector<1x32x16xf32>
    %63 = vector.shape_cast %62 : vector<1x32x16xf32> to vector<32x16xf32>
    %64 = vector.broadcast %61 : vector<32x1xf32> to vector<32x16xf32>
    %65 = arith.mulf %64, %63 : vector<32x16xf32>
    %66 = arith.addf %60, %65 : vector<32x16xf32>
    %67 = vector.extract_strided_slice %23 {offsets = [0, 7], sizes = [32, 1], strides = [1, 1]} : vector<32x16xf32> to vector<32x1xf32>
    %c7 = arith.constant 7 : index
    %c0_26 = arith.constant 0 : index
    %c0_27 = arith.constant 0 : index
    %68 = vector.load %arg4[%c7, %c0_26, %c0_27] : memref<16x32x16xf32, #tpu.memory_space<vmem>>, vector<1x32x16xf32>
    %69 = vector.shape_cast %68 : vector<1x32x16xf32> to vector<32x16xf32>
    %70 = vector.broadcast %67 : vector<32x1xf32> to vector<32x16xf32>
    %71 = arith.mulf %70, %69 : vector<32x16xf32>
    %72 = arith.addf %66, %71 : vector<32x16xf32>
    %73 = vector.extract_strided_slice %23 {offsets = [0, 8], sizes = [32, 1], strides = [1, 1]} : vector<32x16xf32> to vector<32x1xf32>
    %c8 = arith.constant 8 : index
    %c0_28 = arith.constant 0 : index
    %c0_29 = arith.constant 0 : index
    %74 = vector.load %arg4[%c8, %c0_28, %c0_29] : memref<16x32x16xf32, #tpu.memory_space<vmem>>, vector<1x32x16xf32>
    %75 = vector.shape_cast %74 : vector<1x32x16xf32> to vector<32x16xf32>
    %76 = vector.broadcast %73 : vector<32x1xf32> to vector<32x16xf32>
    %77 = arith.mulf %76, %75 : vector<32x16xf32>
    %78 = arith.addf %72, %77 : vector<32x16xf32>
    %79 = vector.extract_strided_slice %23 {offsets = [0, 9], sizes = [32, 1], strides = [1, 1]} : vector<32x16xf32> to vector<32x1xf32>
    %c9 = arith.constant 9 : index
    %c0_30 = arith.constant 0 : index
    %c0_31 = arith.constant 0 : index
    %80 = vector.load %arg4[%c9, %c0_30, %c0_31] : memref<16x32x16xf32, #tpu.memory_space<vmem>>, vector<1x32x16xf32>
    %81 = vector.shape_cast %80 : vector<1x32x16xf32> to vector<32x16xf32>
    %82 = vector.broadcast %79 : vector<32x1xf32> to vector<32x16xf32>
    %83 = arith.mulf %82, %81 : vector<32x16xf32>
    %84 = arith.addf %78, %83 : vector<32x16xf32>
    %85 = vector.extract_strided_slice %23 {offsets = [0, 10], sizes = [32, 1], strides = [1, 1]} : vector<32x16xf32> to vector<32x1xf32>
    %c10 = arith.constant 10 : index
    %c0_32 = arith.constant 0 : index
    %c0_33 = arith.constant 0 : index
    %86 = vector.load %arg4[%c10, %c0_32, %c0_33] : memref<16x32x16xf32, #tpu.memory_space<vmem>>, vector<1x32x16xf32>
    %87 = vector.shape_cast %86 : vector<1x32x16xf32> to vector<32x16xf32>
    %88 = vector.broadcast %85 : vector<32x1xf32> to vector<32x16xf32>
    %89 = arith.mulf %88, %87 : vector<32x16xf32>
    %90 = arith.addf %84, %89 : vector<32x16xf32>
    %91 = vector.extract_strided_slice %23 {offsets = [0, 11], sizes = [32, 1], strides = [1, 1]} : vector<32x16xf32> to vector<32x1xf32>
    %c11 = arith.constant 11 : index
    %c0_34 = arith.constant 0 : index
    %c0_35 = arith.constant 0 : index
    %92 = vector.load %arg4[%c11, %c0_34, %c0_35] : memref<16x32x16xf32, #tpu.memory_space<vmem>>, vector<1x32x16xf32>
    %93 = vector.shape_cast %92 : vector<1x32x16xf32> to vector<32x16xf32>
    %94 = vector.broadcast %91 : vector<32x1xf32> to vector<32x16xf32>
    %95 = arith.mulf %94, %93 : vector<32x16xf32>
    %96 = arith.addf %90, %95 : vector<32x16xf32>
    %97 = vector.extract_strided_slice %23 {offsets = [0, 12], sizes = [32, 1], strides = [1, 1]} : vector<32x16xf32> to vector<32x1xf32>
    %c12 = arith.constant 12 : index
    %c0_36 = arith.constant 0 : index
    %c0_37 = arith.constant 0 : index
    %98 = vector.load %arg4[%c12, %c0_36, %c0_37] : memref<16x32x16xf32, #tpu.memory_space<vmem>>, vector<1x32x16xf32>
    %99 = vector.shape_cast %98 : vector<1x32x16xf32> to vector<32x16xf32>
    %100 = vector.broadcast %97 : vector<32x1xf32> to vector<32x16xf32>
    %101 = arith.mulf %100, %99 : vector<32x16xf32>
    %102 = arith.addf %96, %101 : vector<32x16xf32>
    %103 = vector.extract_strided_slice %23 {offsets = [0, 13], sizes = [32, 1], strides = [1, 1]} : vector<32x16xf32> to vector<32x1xf32>
    %c13 = arith.constant 13 : index
    %c0_38 = arith.constant 0 : index
    %c0_39 = arith.constant 0 : index
    %104 = vector.load %arg4[%c13, %c0_38, %c0_39] : memref<16x32x16xf32, #tpu.memory_space<vmem>>, vector<1x32x16xf32>
    %105 = vector.shape_cast %104 : vector<1x32x16xf32> to vector<32x16xf32>
    %106 = vector.broadcast %103 : vector<32x1xf32> to vector<32x16xf32>
    %107 = arith.mulf %106, %105 : vector<32x16xf32>
    %108 = arith.addf %102, %107 : vector<32x16xf32>
    %109 = vector.extract_strided_slice %23 {offsets = [0, 14], sizes = [32, 1], strides = [1, 1]} : vector<32x16xf32> to vector<32x1xf32>
    %c14 = arith.constant 14 : index
    %c0_40 = arith.constant 0 : index
    %c0_41 = arith.constant 0 : index
    %110 = vector.load %arg4[%c14, %c0_40, %c0_41] : memref<16x32x16xf32, #tpu.memory_space<vmem>>, vector<1x32x16xf32>
    %111 = vector.shape_cast %110 : vector<1x32x16xf32> to vector<32x16xf32>
    %112 = vector.broadcast %109 : vector<32x1xf32> to vector<32x16xf32>
    %113 = arith.mulf %112, %111 : vector<32x16xf32>
    %114 = arith.addf %108, %113 : vector<32x16xf32>
    %115 = vector.extract_strided_slice %23 {offsets = [0, 15], sizes = [32, 1], strides = [1, 1]} : vector<32x16xf32> to vector<32x1xf32>
    %c15 = arith.constant 15 : index
    %c0_42 = arith.constant 0 : index
    %c0_43 = arith.constant 0 : index
    %116 = vector.load %arg4[%c15, %c0_42, %c0_43] : memref<16x32x16xf32, #tpu.memory_space<vmem>>, vector<1x32x16xf32>
    %117 = vector.shape_cast %116 : vector<1x32x16xf32> to vector<32x16xf32>
    %118 = vector.broadcast %115 : vector<32x1xf32> to vector<32x16xf32>
    %119 = arith.mulf %118, %117 : vector<32x16xf32>
    %120 = arith.addf %114, %119 : vector<32x16xf32>
    %121 = arith.mulf %120, %120 : vector<32x16xf32>
    %122 = arith.mulf %120, %121 : vector<32x16xf32>
    %cst_44 = arith.constant 4.471500e-02 : f32
    %123 = vector.broadcast %cst_44 : f32 to vector<32x16xf32>
    %124 = arith.mulf %123, %122 : vector<32x16xf32>
    %125 = arith.addf %120, %124 : vector<32x16xf32>
    %cst_45 = arith.constant 0.797884583 : f32
    %126 = vector.broadcast %cst_45 : f32 to vector<32x16xf32>
    %127 = arith.mulf %126, %125 : vector<32x16xf32>
    %128 = math.tanh %127 : vector<32x16xf32>
    %cst_46 = arith.constant 1.000000e+00 : f32
    %129 = vector.broadcast %cst_46 : f32 to vector<32x16xf32>
    %130 = arith.addf %129, %128 : vector<32x16xf32>
    %cst_47 = arith.constant 5.000000e-01 : f32
    %131 = vector.broadcast %cst_47 : f32 to vector<32x16xf32>
    %132 = arith.mulf %131, %130 : vector<32x16xf32>
    %133 = arith.mulf %120, %132 : vector<32x16xf32>
    %c0_48 = arith.constant 0 : index
    %c0_49 = arith.constant 0 : index
    %134 = vector.load %arg5[%c0_48, %c0_49] : memref<32x32xf32, #tpu.memory_space<vmem>>, vector<32x32xf32>
    %cst_50 = arith.constant dense<0.000000e+00> : vector<32x16xf32>
    %135 = tpu.matmul %134, %133, %cst_50 {dimension_numbers = #tpu.dot_dimension_numbers<[1], [0], [0], [1], [0, 0, 1, 1], [], []>, precision = #tpu.contract_precision<fp32>} : vector<32x32xf32>, vector<32x16xf32>, vector<32x16xf32> -> vector<32x16xf32>
    %c0_51 = arith.constant 0 : index
    %c0_52 = arith.constant 0 : index
    %136 = vector.load %arg6[%c0_51, %c0_52] : memref<32x1xf32, #tpu.memory_space<vmem>>, vector<32x1xf32>
    %137 = vector.broadcast %136 : vector<32x1xf32> to vector<32x16xf32>
    %138 = arith.addf %135, %137 : vector<32x16xf32>
    %139 = arith.addf %138, %1 : vector<32x16xf32>
    %c0_53 = arith.constant 0 : index
    %c0_54 = arith.constant 0 : index
    %c0_55 = arith.constant 0 : index
    %140 = vector.load %arg7[%c0_53, %c0_54, %c0_55] : memref<1x32x16xf32, #tpu.memory_space<vmem>>, vector<1x32x16xf32>
    %141 = vector.shape_cast %140 : vector<1x32x16xf32> to vector<32x16xf32>
    %142 = vector.shape_cast %139 : vector<32x16xf32> to vector<1x32x16xf32>
    tpu.vector_store %arg7[%c0_53, %c0_54, %c0_55], %142 {strides = array<i32>} : memref<1x32x16xf32, #tpu.memory_space<vmem>>, vector<1x32x16xf32>,
    return
  }
  func.func @transform_0(%arg0: i32) -> (i32, i32, i32) {
    %c0_i32 = arith.constant 0 : i32
    %c0_i32_0 = arith.constant 0 : i32
    %c0_i32_1 = arith.constant 0 : i32
    return %arg0, %c0_i32, %c0_i32_0 : i32, i32, i32
  }
  func.func @transform_1(%arg0: i32) -> (i32, i32) {
    %c0_i32 = arith.constant 0 : i32
    %c0_i32_0 = arith.constant 0 : i32
    %c0_i32_1 = arith.constant 0 : i32
    return %c0_i32, %c0_i32_0 : i32, i32
  }
  func.func @transform_2(%arg0: i32) -> (i32, i32) {
    %c0_i32 = arith.constant 0 : i32
    %c0_i32_0 = arith.constant 0 : i32
    %c0_i32_1 = arith.constant 0 : i32
    return %c0_i32, %c0_i32_0 : i32, i32
  }
  func.func @transform_3(%arg0: i32) -> (i32, i32, i32) {
    %c0_i32 = arith.constant 0 : i32
    %c0_i32_0 = arith.constant 0 : i32
    %c0_i32_1 = arith.constant 0 : i32
    %c0_i32_2 = arith.constant 0 : i32
    return %c0_i32, %c0_i32_0, %c0_i32_1 : i32, i32, i32
  }
  func.func @transform_4(%arg0: i32) -> (i32, i32) {
    %c0_i32 = arith.constant 0 : i32
    %c0_i32_0 = arith.constant 0 : i32
    %c0_i32_1 = arith.constant 0 : i32
    return %c0_i32, %c0_i32_0 : i32, i32
  }
  func.func @transform_5(%arg0: i32) -> (i32, i32) {
    %c0_i32 = arith.constant 0 : i32
    %c0_i32_0 = arith.constant 0 : i32
    %c0_i32_1 = arith.constant 0 : i32
    return %c0_i32, %c0_i32_0 : i32, i32
  }
  func.func @transform_6(%arg0: i32) -> (i32, i32, i32) {
    %c0_i32 = arith.constant 0 : i32
    %c0_i32_0 = arith.constant 0 : i32
    %c0_i32_1 = arith.constant 0 : i32
    return %arg0, %c0_i32, %c0_i32_0 : i32, i32, i32
  }
}

</mosaic_0001>

<bundles_post_ra>
// kernel: tpu_custom_call.1
= control target key start
LH: loop header
LB: loop body
LE: loop exit
PB: predicated region body
PF: predicated region fallthrough
CT: control target
= control target key end

     0   :  { %s1934_s21 = smov 0   ;;  %s2494_s0 = inlined_call_operand.vmem [shape: f32[2,32,16], index: 0, kind: input, shape index: {}]   ;;  %s2495_s1 = inlined_call_operand.vmem [shape: f32[32,1], index: 1, kind: input, shape index: {}]   ;;  %s2496_s2 = inlined_call_operand.vmem [shape: f32[32,1], index: 2, kind: input, shape index: {}]   ;;  %s2497_s3 = inlined_call_operand.vmem [shape: f32[16,32,16], index: 3, kind: input, shape index: {}]   ;;  %s2498_s4 = inlined_call_operand.vmem [shape: f32[32,32], index: 4, kind: input, shape index: {}]   ;;  %s2499_s5 = inlined_call_operand.vmem [shape: f32[32,1], index: 5, kind: input, shape index: {}]   ;;  %s2500_s6 = inlined_call_operand.vmem [shape: f32[2,32,16], index: 6, kind: output, shape index: {}]  }
   0x1 LB: > { %s1577_s22 = sadd.s32 4294967295, %s1881_s21   ;;  %p1581_p0 = scmp.ge.s32.totalorder %s1881_s21, 1  ;;  %s1881_s21 = sphi %s1934_s21, %s16_s21  }
   0x2   : > { %p212_p1 = scmp.lt.s32.totalorder %s1881_s21, 3 }
   0x4   : > { %p213_p2 = pnand %p1581_p0, %p212_p1 }
   0x5   : > { %p242_p3 = scmp.lt.s32.totalorder (!%p213_p2), %s1577_s22, 1 }
   0x6   : > { %216 = sbr.rel (%p213_p2) target bundleno = 726 (0x2d6), region = 44 }
   0xb   : > { %v331_v0 = vld [vmem:[%s2496_s2 + $0x18] sm:$0xff]  ;;  %v1883_v2 = vmov 0   ;;  %s2502_s22 = smov (!%p242_p3, %s1577_s22), 1  ;;  %v302_v3 = vld [vmem:[%s2495_s1 + $0x10] sm:$0xff]  ;;  %v301_v4 = vld [vmem:[%s2495_s1 + $0x8] sm:$0xff]  ;;  %vm256_vm0 = vcmask 130048  }
   0xc   : > { %v303_v1 = vld [vmem:[%s2495_s1 + $0x18] sm:$0xff]  ;;  %1807 = vset.pattern.permute.xlu1 %v1883_v2  ;;  %1806 = vset.pattern.permute.xlu0 %v1883_v2  ;;  %s1648_s7 = sshll.u32 %s2502_s22, 5  ;;  %v330_v7 = vld [vmem:[%s2496_s2 + $0x10] sm:$0xff]  ;;  %v300_v8 = vld [vmem:[%s2495_s1] sm:$0xff]  ;;  %v1884_v19 = vmov 1   ;;  %vm887_vm1 = vcmask 261120  }
   0xd   : > { %349 = vperm.xlu1 %1807, %v331_v0   ;;  %321 = vperm.xlu0 %1806, %v303_v1   ;;  %s1964_s10 = scalar_lea.vmem %s2494_s0, %s1648_s7  ;;  %v329_v12 = vld [vmem:[%s2496_s2 + $0x8] sm:$0xff]  ;;  %v328_v13 = vld [vmem:[%s2496_s2] sm:$0xff]  ;;  %s251_s27 = scalar_lea.vmem %s2500_s6, %s1648_s7 }
   0xe   : > { %v252_v5 = vld [vmem:[%s1964_s10] sm:$0xff]  ;;  %v253_v6 = vld [vmem:[%s1964_s10 + $0x8] sm:$0xff]  ;;  %v254_v11 = vld [vmem:[%s1964_s10 + $0x10] sm:$0xff] }
   0xf   : > { %v257_v9 = vsel %vm256_vm0, %v252_v5, 0.0  ;;  %v258_v10 = vsel %vm256_vm0, %v253_v6, 0.0  ;;  %v260_v15 = vsel %vm256_vm0, %v254_v11, 0.0  ;;  %v255_v16 = vld [vmem:[%s1964_s10 + $0x18] sm:$0xff] }
  0x10   : > { %v259_v14 = vadd.f32 %v258_v10, %v257_v9  ;;  %v262_v18 = vsel %vm256_vm0, %v255_v16, 0.0  ;;  %v1886_v10 = vmov 3  }
  0x11   : > { %316 = vperm.xlu0 %1806, %v302_v3   ;;  %311 = vperm.xlu1 %1807, %v301_v4  }
  0x12   : > { %v261_v17 = vadd.f32 %v260_v15, %v259_v14  ;;  %v1890_v14 = vmov 6   ;;  %v1891_v15 = vmov 9  }
  0x14   : > { %v263_v20 = vadd.f32 %v262_v18, %v261_v17  ;;  %v1893_v17 = vmov 11   ;;  %v1894_v18 = vmov 10  }
  0x15   : > { %344 = vperm.xlu0 %1806, %v330_v7   ;;  %306 = vperm.xlu1 %1807, %v300_v8  }
  0x16   : > { %v264_v21 = vrot.slane %v263_v20, 4 }
  0x18   : > { %v265_v22 = vadd.f32 %v264_v21, %v263_v20  ;;  %v1896_v20 = vmov 12   ;;  %v1897_v21 = vmov 15  }
  0x19   : > { %339 = vperm.xlu0 %1806, %v329_v12   ;;  %334 = vperm.xlu1 %1807, %v328_v13   ;;  %v1888_v12 = vmov 4   ;;  %v1889_v13 = vmov 7  }
  0x1a   : > { %v266_v23 = vrot.slane %v265_v22, 2 }
  0x1c   : > { %v267_v24 = vadd.f32 %v266_v23, %v265_v22 }
  0x1d   : > { %1808 = vset.pattern.permute.xlu1 %v1884_v19 }
  0x1e   : > { %v268_v25 = vrot.slane %v267_v24, 1 }
  0x20   : > { %v269_v26 = vadd.f32 %v268_v25, %v267_v24  ;;  %v1588_v24 = vld [vmem:[%s2497_s3 + $0x30] sm:$0xff] }
  0x21   : > { %v358_v25 = vld [vmem:[%s2497_s3 + $0x10] sm:$0xff] }
  0x22   : > { %v271_v27 = vmul.f32 0.03125, %v269_v26 }
  0x24   : > { %v272_v28 = vsub.f32 %v252_v5, %v271_v27  ;;  %v273_v29 = vsub.f32 %v253_v6, %v271_v27  ;;  %v274_v30 = vsub.f32 %v254_v11, %v271_v27  ;;  %v275_v33 = vsub.f32 %v255_v16, %v271_v27 }
  0x25   : > { %v1885_v5 = vmov 2   ;;  %v1887_v11 = vmov 5   ;;  %v1892_v16 = vmov 8  }
  0x26   : > { %v276_v31 = vmul.f32 %v272_v28, %v272_v28  ;;  %v277_v32 = vmul.f32 %v273_v29, %v273_v29  ;;  %v278_v34 = vmul.f32 %v274_v30, %v274_v30  ;;  %v279_v38 = vmul.f32 %v275_v33, %v275_v33 }
  0x28   : > { %v280_v35 = vsel %vm256_vm0, %v276_v31, 0.0  ;;  %v281_v36 = vsel %vm256_vm0, %v277_v32, 0.0  ;;  %v283_v39 = vsel %vm256_vm0, %v278_v34, 0.0  ;;  %v285_v41 = vsel %vm256_vm0, %v279_v38, 0.0  ;;  %v359_v34 = vld [vmem:[%s2497_s3 + $0x18] sm:$0xff] }
  0x29   : > { %v282_v37 = vadd.f32 %v281_v36, %v280_v35  ;;  %v357_v35 = vld [vmem:[%s2497_s3 + $0x8] sm:$0xff] }
  0x2a   : > { %v1587_v36 = vld [vmem:[%s2497_s3 + $0x28] sm:$0xff] }
  0x2b   : > { %v284_v40 = vadd.f32 %v283_v39, %v282_v37  ;;  %v1593_v37 = vld [vmem:[%s2497_s3 + $0x58] sm:$0xff] }
  0x2d   : > { %v286_v42 = vadd.f32 %v285_v41, %v284_v40 }
  0x2f   : > { %v287_v43 = vrot.slane %v286_v42, 4 }
  0x31   : > { %v288_v44 = vadd.f32 %v287_v43, %v286_v42 }
  0x33   : > { %v289_v45 = vrot.slane %v288_v44, 2 }
  0x35   : > { %v290_v46 = vadd.f32 %v289_v45, %v288_v44 }
  0x37   : > { %v291_v47 = vrot.slane %v290_v46, 1 }
  0x39   : > { %v292_v48 = vadd.f32 %v291_v47, %v290_v46  ;;  %v1597_v46 = vld [vmem:[%s2497_s3 + $0x78] sm:$0xff] }
  0x3b   : > { %v293_v49 = vmul.f32 0.03125, %v292_v48 }
  0x3d   : > { %v294_v50 = vadd.f32 1e-05, %v293_v49 }
  0x3f   : > { %1861 = vrsqrt.f32 %v294_v50 }
  0x4c   : > { %v1862_v51 = vpop.eup %1861 }
  0x4d   : > { %v299_v52 = vmul.f32 %v1862_v51, %v275_v33  ;;  %v298_v57 = vmul.f32 %v1862_v51, %v274_v30  ;;  %v297_v60 = vmul.f32 %v1862_v51, %v273_v29  ;;  %v296_v6 = vmul.f32 %v1862_v51, %v272_v28  ;;  %v1589_v33 = vld [vmem:[%s2497_s3 + $0x38] sm:$0xff]  ;;  %v356_v51 = vld [vmem:[%s2497_s3] sm:$0xff] }
  0x88   : > { %v322_v53 = vpop.permute.xlu0 %321  ;;  %v350_v55 = vpop.permute.xlu1 %349 }
  0x89   : > { %v327_v54 = vmul.f32 %v322_v53, %v299_v52 }
  0x8b   : > { %v1991_v56 = vadd.f32 %v350_v55, %v327_v54  ;;  %v1586_v54 = vld [vmem:[%s2497_s3 + $0x20] sm:$0xff] }
  0x8c   : > { %v317_v58 = vpop.permute.xlu0 %316  ;;  %v312_v61 = vpop.permute.xlu1 %311 }
  0x8d   : > { %406 = vperm.xlu1 %1808, %v1991_v56   ;;  %377 = vperm.xlu0 %1806, %v1991_v56   ;;  %v326_v59 = vmul.f32 %v317_v58, %v298_v57  ;;  %v325_v0 = vmul.f32 %v312_v61, %v297_v60  ;;  %v1591_v60 = vld [vmem:[%s2497_s3 + $0x48] sm:$0xff] }
  0x90   : > { %v345_v62 = vpop.permute.xlu0 %344  ;;  %v307_v4 = vpop.permute.xlu1 %306 }
  0x91   : > { %v1995_v63 = vadd.f32 %v345_v62, %v326_v59  ;;  %v324_v8 = vmul.f32 %v307_v4, %v296_v6  ;;  %v1898_v6 = vmov 14  }
  0x93   : > { %402 = vperm.xlu1 %1808, %v1995_v63   ;;  %372 = vperm.xlu0 %1806, %v1995_v63  }
  0x94   : > { %v340_v1 = vpop.permute.xlu0 %339  ;;  %v335_v7 = vpop.permute.xlu1 %334 }
  0x95   : > { %v1999_v3 = vadd.f32 %v340_v1, %v325_v0  ;;  %v2007_v9 = vadd.f32 %v335_v7, %v324_v8  ;;  %v1601_v1 = vld [vmem:[%s2497_s3 + $0x98] sm:$0xff]  ;;  %v1592_v7 = vld [vmem:[%s2497_s3 + $0x50] sm:$0xff] }
  0x97   : > { %1810 = vset.pattern.permute.xlu1 %v1883_v2  ;;  %1809 = vset.pattern.permute.xlu0 %v1885_v5 }
  0x98   : > { %435 = vperm.xlu0 %1809, %v1991_v56   ;;  %367 = vperm.xlu1 %1810, %v1999_v3  }
  0x9c   : > { %431 = vperm.xlu0 %1809, %v1995_v63   ;;  %1811 = vset.pattern.permute.xlu1 %v1884_v19 }
  0x9d   : > { %398 = vperm.xlu1 %1811, %v1999_v3  }
  0xa0   : > { %1813 = vset.pattern.permute.xlu0 %v1883_v2 }
  0xa1   : > { %1812 = vset.pattern.permute.xlu1 %v1886_v10  ;;  %362 = vperm.xlu0 %1813, %v2007_v9  }
  0xa2   : > { %464 = vperm.xlu1 %1812, %v1991_v56  }
  0xa5   : > { %1816 = vset.pattern.permute.xlu0 %v1886_v10 }
  0xa6   : > { %1814 = vset.pattern.permute.xlu1 %v1884_v19  ;;  %460 = vperm.xlu0 %1816, %v1995_v63   ;;  %v1895_v19 = vmov 13  }
  0xa7   : > { %394 = vperm.xlu1 %1814, %v2007_v9  }
  0xaa   : > { %456 = vperm.xlu0 %1816, %v1999_v3  }
  0xab   : > { %1815 = vset.pattern.permute.xlu1 %v1885_v5 }
  0xac   : > { %427 = vperm.xlu1 %1815, %v1999_v3  }
  0xae   : > { %1820 = vset.pattern.permute.xlu0 %v1887_v11 }
  0xaf   : > { %522 = vperm.xlu0 %1820, %v1991_v56  }
  0xb0   : > { %1817 = vset.pattern.permute.xlu1 %v1888_v12 }
  0xb1   : > { %493 = vperm.xlu1 %1817, %v1991_v56  }
  0xb3   : > { %518 = vperm.xlu0 %1820, %v1995_v63  }
  0xb5   : > { %1818 = vset.pattern.permute.xlu1 %v1885_v5 }
  0xb6   : > { %423 = vperm.xlu1 %1818, %v2007_v9  }
  0xb7   : > { %1824 = vset.pattern.permute.xlu0 %v1888_v12 }
  0xb8   : > { %481 = vperm.xlu0 %1824, %v2007_v9  }
  0xba   : > { %1819 = vset.pattern.permute.xlu1 %v1888_v12 }
  0xbb   : > { %489 = vperm.xlu1 %1819, %v1995_v63  }
  0xbc   : > { %1827 = vset.pattern.permute.xlu0 %v1889_v13 }
  0xbd   : > { %580 = vperm.xlu0 %1827, %v1991_v56  }
  0xbf   : > { %1821 = vset.pattern.permute.xlu1 %v1886_v10  ;;  %v1590_v10 = vld [vmem:[%s2497_s3 + $0x40] sm:$0xff] }
  0xc0   : > { %452 = vperm.xlu1 %1821, %v2007_v9  }
  0xc1   : > { %576 = vperm.xlu0 %1827, %v1995_v63  }
  0xc4   : > { %1822 = vset.pattern.permute.xlu1 %v1888_v12 }
  0xc5   : > { %485 = vperm.xlu1 %1822, %v1999_v3   ;;  %1831 = vset.pattern.permute.xlu0 %v1890_v14 }
  0xc6   : > { %539 = vperm.xlu0 %1831, %v2007_v9  }
  0xc9   : > { %1823 = vset.pattern.permute.xlu1 %v1890_v14 }
  0xca   : > { %551 = vperm.xlu1 %1823, %v1991_v56   ;;  %1834 = vset.pattern.permute.xlu0 %v1891_v15 }
  0xcb   : > { %638 = vperm.xlu0 %1834, %v1991_v56  }
  0xce   : > { %1825 = vset.pattern.permute.xlu1 %v1887_v11 }
  0xcf   : > { %514 = vperm.xlu1 %1825, %v1999_v3   ;;  %634 = vperm.xlu0 %1834, %v1995_v63  }
  0xd3   : > { %1826 = vset.pattern.permute.xlu1 %v1890_v14  ;;  %1838 = vset.pattern.permute.xlu0 %v1892_v16 }
  0xd4   : > { %547 = vperm.xlu1 %1826, %v1995_v63   ;;  %597 = vperm.xlu0 %1838, %v2007_v9  }
  0xd8   : > { %1828 = vset.pattern.permute.xlu1 %v1887_v11  ;;  %1841 = vset.pattern.permute.xlu0 %v1893_v17  ;;  %v1596_v11 = vld [vmem:[%s2497_s3 + $0x70] sm:$0xff] }
  0xd9   : > { %510 = vperm.xlu1 %1828, %v2007_v9   ;;  %696 = vperm.xlu0 %1841, %v1991_v56  }
  0xdd   : > { %1829 = vset.pattern.permute.xlu1 %v1890_v14  ;;  %692 = vperm.xlu0 %1841, %v1995_v63  }
  0xde   : > { %543 = vperm.xlu1 %1829, %v1999_v3  }
  0xe1   : > { %1845 = vset.pattern.permute.xlu0 %v1894_v18 }
  0xe2   : > { %1830 = vset.pattern.permute.xlu1 %v1892_v16  ;;  %655 = vperm.xlu0 %1845, %v2007_v9  }
  0xe3   : > { %609 = vperm.xlu1 %1830, %v1991_v56  }
  0xe6   : > { %1848 = vset.pattern.permute.xlu0 %v1895_v19 }
  0xe7   : > { %1832 = vset.pattern.permute.xlu1 %v1889_v13  ;;  %754 = vperm.xlu0 %1848, %v1991_v56  }
  0xe8   : > { %572 = vperm.xlu1 %1832, %v1999_v3  }
  0xeb   : > { %750 = vperm.xlu0 %1848, %v1995_v63  }
  0xec   : > { %1833 = vset.pattern.permute.xlu1 %v1892_v16 }
  0xed   : > { %605 = vperm.xlu1 %1833, %v1995_v63  }
  0xef   : > { %1852 = vset.pattern.permute.xlu0 %v1896_v20 }
  0xf0   : > { %713 = vperm.xlu0 %1852, %v2007_v9  }
  0xf1   : > { %1835 = vset.pattern.permute.xlu1 %v1889_v13 }
  0xf2   : > { %568 = vperm.xlu1 %1835, %v2007_v9  }
  0xf4   : > { %1855 = vset.pattern.permute.xlu0 %v1897_v21 }
  0xf5   : > { %812 = vperm.xlu0 %1855, %v1991_v56  }
  0xf6   : > { %1836 = vset.pattern.permute.xlu1 %v1892_v16 }
  0xf7   : > { %601 = vperm.xlu1 %1836, %v1999_v3  }
  0xf9   : > { %808 = vperm.xlu0 %1855, %v1995_v63  }
  0xfb   : > { %1837 = vset.pattern.permute.xlu1 %v1894_v18 }
  0xfc   : > { %667 = vperm.xlu1 %1837, %v1991_v56  }
  0xfd   : > { %804 = vperm.xlu0 %1855, %v1999_v3  }
 0x100   : > { %1839 = vset.pattern.permute.xlu1 %v1891_v15 }
 0x101   : > { %630 = vperm.xlu1 %1839, %v1999_v3   ;;  %1859 = vset.pattern.permute.xlu0 %v1883_v2 }
 0x105   : > { %1840 = vset.pattern.permute.xlu1 %v1894_v18 }
 0x106   : > { %663 = vperm.xlu1 %1840, %v1995_v63  }
 0x108   : > { %v407_v22 = vpop.permute.xlu1 %406  ;;  %v378_v23 = vpop.permute.xlu0 %377 }
 0x109   : > { %v412_v38 = vmul.f32 %v1589_v33, %v407_v22  ;;  %v383_v39 = vmul.f32 %v378_v23, %v359_v34  ;;  %v1605_v33 = vld [vmem:[%s2497_s3 + $0xb8] sm:$0xff] }
 0x10a   : > { %1842 = vset.pattern.permute.xlu1 %v1891_v15 }
 0x10b   : > { %626 = vperm.xlu1 %1842, %v2007_v9   ;;  %v416_v47 = vadd.f32 %v412_v38, %v383_v39 }
 0x10e   : > { %v403_v26 = vpop.permute.xlu1 %402  ;;  %v373_v27 = vpop.permute.xlu0 %372 }
 0x10f   : > { %v411_v28 = vmul.f32 %v1588_v24, %v403_v26  ;;  %v382_v29 = vmul.f32 %v373_v27, %v358_v25  ;;  %1843 = vset.pattern.permute.xlu1 %v1894_v18  ;;  %v1594_v25 = vld [vmem:[%s2497_s3 + $0x60] sm:$0xff] }
 0x110   : > { %659 = vperm.xlu1 %1843, %v1999_v3  }
 0x111   : > { %v415_v30 = vadd.f32 %v411_v28, %v382_v29  ;;  %v1595_v28 = vld [vmem:[%s2497_s3 + $0x68] sm:$0xff] }
 0x113   : > { %v368_v31 = vpop.permute.xlu1 %367  ;;  %v436_v32 = vpop.permute.xlu0 %435 }
 0x114   : > { %1844 = vset.pattern.permute.xlu1 %v1896_v20  ;;  %v381_v41 = vmul.f32 %v368_v31, %v357_v35  ;;  %v441_v43 = vmul.f32 %v1593_v37, %v436_v32  ;;  %v1609_v37 = vld [vmem:[%s2497_s3 + $0xd8] sm:$0xff] }
 0x115   : > { %725 = vperm.xlu1 %1844, %v1991_v56  }
 0x116   : > { %v445_v49 = vadd.f32 %v441_v43, %v416_v47  ;;  %v1603_v43 = vld [vmem:[%s2497_s3 + $0xa8] sm:$0xff] }
 0x117   : > { %v432_v44 = vpop.permute.xlu0 %431 }
 0x118   : > { %v399_v40 = vpop.permute.xlu1 %398  ;;  %v440_v13 = vmul.f32 %v1592_v7, %v432_v44 }
 0x119   : > { %v410_v42 = vmul.f32 %v1587_v36, %v399_v40  ;;  %1846 = vset.pattern.permute.xlu1 %v1893_v17 }
 0x11a   : > { %688 = vperm.xlu1 %1846, %v1999_v3   ;;  %v444_v18 = vadd.f32 %v440_v13, %v415_v30 }
 0x11b   : > { %v414_v45 = vadd.f32 %v410_v42, %v381_v41 }
 0x11c   : > { %v363_v52 = vpop.permute.xlu0 %362 }
 0x11d   : > { %v465_v48 = vpop.permute.xlu1 %464  ;;  %v380_v57 = vmul.f32 %v363_v52, %v356_v51 }
 0x11e   : > { %v470_v50 = vmul.f32 %v1597_v46, %v465_v48  ;;  %1847 = vset.pattern.permute.xlu1 %v1896_v20  ;;  %v1608_v48 = vld [vmem:[%s2497_s3 + $0xd0] sm:$0xff] }
 0x11f   : > { %721 = vperm.xlu1 %1847, %v1995_v63  }
 0x120   : > { %v474_v53 = vadd.f32 %v470_v50, %v445_v49 }
 0x121   : > { %v461_v12 = vpop.permute.xlu0 %460 }
 0x122   : > { %v395_v55 = vpop.permute.xlu1 %394  ;;  %v469_v16 = vmul.f32 %v1596_v11, %v461_v12 }
 0x123   : > { %v409_v58 = vmul.f32 %v1586_v54, %v395_v55  ;;  %1849 = vset.pattern.permute.xlu1 %v1893_v17 }
 0x124   : > { %684 = vperm.xlu1 %1849, %v2007_v9   ;;  %v473_v22 = vadd.f32 %v469_v16, %v444_v18 }
 0x125   : > { %v413_v59 = vadd.f32 %v409_v58, %v380_v57  ;;  %v457_v26 = vpop.permute.xlu0 %456 }
 0x126   : > { %v468_v31 = vmul.f32 %v1595_v28, %v457_v26 }
 0x127   : > { %v428_v61 = vpop.permute.xlu1 %427 }
 0x128   : > { %v439_v62 = vmul.f32 %v1591_v60, %v428_v61  ;;  %1850 = vset.pattern.permute.xlu1 %v1896_v20 }
 0x129   : > { %717 = vperm.xlu1 %1850, %v1999_v3  }
 0x12a   : > { %v443_v0 = vadd.f32 %v439_v62, %v414_v45  ;;  %v523_v34 = vpop.permute.xlu0 %522  ;;  %v1604_v45 = vld [vmem:[%s2497_s3 + $0xb0] sm:$0xff] }
 0x12b   : > { %v528_v38 = vmul.f32 %v1605_v33, %v523_v34  ;;  %v866_v33 = vld [vmem:[%s2499_s5 + $0x18] sm:$0xff] }
 0x12c   : > { %v494_v4 = vpop.permute.xlu1 %493  ;;  %v472_v35 = vadd.f32 %v468_v31, %v443_v0 }
 0x12d   : > { %v499_v5 = vmul.f32 %v1601_v1, %v494_v4  ;;  %1851 = vset.pattern.permute.xlu1 %v1898_v6 }
 0x12e   : > { %783 = vperm.xlu1 %1851, %v1991_v56   ;;  %v1600_v56 = vld [vmem:[%s2497_s3 + $0x90] sm:$0xff]  ;;  %v519_v44 = vpop.permute.xlu0 %518 }
 0x12f   : > { %v503_v8 = vadd.f32 %v499_v5, %v474_v53  ;;  %v527_v49 = vmul.f32 %v1604_v45, %v519_v44  ;;  %v859_v5 = vld [vmem:[%s2498_s4] sm:$0xff] }
 0x131   : > { %v424_v14 = vpop.permute.xlu1 %423  ;;  %v532_v40 = vadd.f32 %v528_v38, %v503_v8 }
 0x132   : > { %v438_v15 = vmul.f32 %v1590_v10, %v424_v14  ;;  %1853 = vset.pattern.permute.xlu1 %v1895_v19 }
 0x133   : > { %746 = vperm.xlu1 %1853, %v1999_v3   ;;  %v482_v51 = vpop.permute.xlu0 %481 }
 0x134   : > { %v442_v17 = vadd.f32 %v438_v15, %v413_v59 }
 0x136   : > { %v490_v20 = vpop.permute.xlu1 %489 }
 0x137   : > { %v498_v23 = vmul.f32 %v1600_v56, %v490_v20  ;;  %1854 = vset.pattern.permute.xlu1 %v1898_v6 }
 0x138   : > { %779 = vperm.xlu1 %1854, %v1995_v63   ;;  %v1599_v63 = vld [vmem:[%s2497_s3 + $0x88] sm:$0xff]  ;;  %v581_v4 = vpop.permute.xlu0 %580 }
 0x139   : > { %v502_v24 = vadd.f32 %v498_v23, %v473_v22 }
 0x13b   : > { %v453_v27 = vpop.permute.xlu1 %452  ;;  %v531_v52 = vadd.f32 %v527_v49, %v502_v24 }
 0x13c   : > { %v467_v29 = vmul.f32 %v1594_v25, %v453_v27  ;;  %1856 = vset.pattern.permute.xlu1 %v1895_v19  ;;  %v577_v11 = vpop.permute.xlu0 %576 }
 0x13d   : > { %742 = vperm.xlu1 %1856, %v2007_v9  }
 0x13e   : > { %v471_v30 = vadd.f32 %v467_v29, %v442_v17 }
 0x140   : > { %v486_v32 = vpop.permute.xlu1 %485 }
 0x141   : > { %v497_v36 = vmul.f32 %v1599_v63, %v486_v32  ;;  %1857 = vset.pattern.permute.xlu1 %v1898_v6  ;;  %v889_v6 = vsel %vm887_vm1, %v859_v5, 0  ;;  %v2186_v16 = vpop.permute.xlu0 %539  ;;  %v863_v63 = vld [vmem:[%s2499_s5] sm:$0xff]  ;;  %v865_v32 = vld [vmem:[%s2499_s5 + $0x10] sm:$0xff]  ;;  %v1637_v5 = vld [vmem:[%s2497_s3 + $0x1b8] sm:$0xff] }
 0x142   : > { %775 = vperm.xlu1 %1857, %v1999_v3   ;;  %v2176_v8 = vand.u32 4294901760, %v889_v6  ;;  %869 = vperm.xlu0 %1859, %v863_v63  }
 0x143   : > { %v501_v19 = vadd.f32 %v497_v36, %v472_v35  ;;  %v1613_v35 = vld [vmem:[%s2497_s3 + $0xf8] sm:$0xff] }
 0x144   : > { %v2179_v10 = vsub.f32 %v889_v6, %v2176_v8  ;;  %1720 = vmatprep.mubr.f32.mxu1 %v2176_v8  ;;  %v1617_v36 = vld [vmem:[%s2497_s3 + $0x118] sm:$0xff] }
 0x145   : > { %v552_v39 = vpop.permute.xlu1 %551 }
 0x146   : > { %v557_v41 = vmul.f32 %v1609_v37, %v552_v39  ;;  %771 = vperm.xlu1 %1857, %v2007_v9   ;;  %v971_v12 = vand.u32 4294901760, %v2179_v10  ;;  %v639_v18 = vpop.permute.xlu0 %638  ;;  %884 = vperm.xlu0 %1859, %v866_v33   ;;  %v586_v37 = vmul.f32 %v1613_v35, %v581_v4  ;;  %v1606_v33 = vld [vmem:[%s2497_s3 + $0xc0] sm:$0xff] }
 0x148   : > { %v2141_v42 = vadd.f32 %v557_v41, %v532_v40  ;;  %v972_v14 = vsub.f32 %v2179_v10, %v971_v12  ;;  %v1621_v41 = vld [vmem:[%s2497_s3 + $0x138] sm:$0xff] }
 0x149   : > { %v644_v45 = vmul.f32 %v1621_v41, %v639_v18  ;;  %v1628_v18 = vld [vmem:[%s2497_s3 + $0x170] sm:$0xff] }
 0x14a   : > { %1858 = vset.pattern.permute.xlu1 %v1897_v21  ;;  %v515_v3 = vpop.permute.xlu1 %514  ;;  %v1598_v21 = vld [vmem:[%s2497_s3 + $0x80] sm:$0xff]  ;;  %v973_v15 = vand.u32 4294901760, %v972_v14  ;;  %v635_v22 = vpop.permute.xlu0 %634  ;;  %v590_v40 = vadd.f32 %v586_v37, %v2141_v42  ;;  %v1616_v42 = vld [vmem:[%s2497_s3 + $0x110] sm:$0xff] }
 0x14b   : > { %v526_v46 = vmul.f32 %v1603_v43, %v515_v3  ;;  %800 = vperm.xlu1 %1858, %v2007_v9   ;;  %v1602_v9 = vld [vmem:[%s2497_s3 + $0xa0] sm:$0xff]  ;;  %v496_v55 = vmul.f32 %v1598_v21, %v482_v51  ;;  %v1625_v43 = vld [vmem:[%s2497_s3 + $0x158] sm:$0xff] }
 0x14c   : > { %1706 = vmatprep.mubr.f32.mxu0 %v973_v15  ;;  %v1633_v21 = vld [vmem:[%s2497_s3 + $0x198] sm:$0xff] }
 0x14d   : > { %v530_v47 = vadd.f32 %v526_v46, %v501_v19  ;;  %v500_v58 = vadd.f32 %v496_v55, %v471_v30  ;;  %v864_v30 = vld [vmem:[%s2499_s5 + $0x8] sm:$0xff] }
 0x14f   : > { %v548_v50 = vpop.permute.xlu1 %547  ;;  %1860 = vset.pattern.permute.xlu1 %v1883_v2  ;;  %v1607_v2 = vld [vmem:[%s2497_s3 + $0xc8] sm:$0xff]  ;;  %v2194_v24 = vpop.permute.xlu0 %597 }
 0x150   : > { %v556_v53 = vmul.f32 %v1608_v48, %v548_v50  ;;  %874 = vperm.xlu1 %1860, %v864_v30   ;;  %v1629_v50 = vld [vmem:[%s2497_s3 + $0x178] sm:$0xff]  ;;  %v1611_v30 = vld [vmem:[%s2497_s3 + $0xe8] sm:$0xff] }
 0x152   : > { %v2158_v54 = vadd.f32 %v556_v53, %v531_v52 }
 0x154   : > { %v511_v57 = vpop.permute.xlu1 %510  ;;  %v697_v26 = vpop.permute.xlu0 %696  ;;  %879 = vperm.xlu1 %1860, %v865_v32  }
 0x155   : > { %v525_v59 = vmul.f32 %v1602_v9, %v511_v57  ;;  %v702_v55 = vmul.f32 %v1629_v50, %v697_v26 }
 0x157   : > { %v2163_v60 = vadd.f32 %v525_v59, %v500_v58  ;;  %v1620_v59 = vld [vmem:[%s2497_s3 + $0x130] sm:$0xff] }
 0x158   : > { %v693_v28 = vpop.permute.xlu0 %692 }
 0x159   : > { %v544_v61 = vpop.permute.xlu1 %543  ;;  %v701_v35 = vmul.f32 %v1628_v18, %v693_v28  ;;  %v1636_v28 = vld [vmem:[%s2497_s3 + $0x1b0] sm:$0xff] }
 0x15a   : > { %v555_v62 = vmul.f32 %v1607_v2, %v544_v61  ;;  %v1624_v61 = vld [vmem:[%s2497_s3 + $0x150] sm:$0xff] }
 0x15c   : > { %v2168_v0 = vadd.f32 %v555_v62, %v530_v47  ;;  %v1612_v47 = vld [vmem:[%s2497_s3 + $0xf0] sm:$0xff] }
 0x15d   : > { %v2212_v34 = vpop.permute.xlu0 %655  ;;  %v585_v52 = vmul.f32 %v1612_v47, %v577_v11 }
 0x15e   : > { %v610_v1 = vpop.permute.xlu1 %609 }
 0x15f   : > { %v615_v38 = vmul.f32 %v1617_v36, %v610_v1  ;;  %v589_v57 = vadd.f32 %v585_v52, %v2158_v54  ;;  %v643_v54 = vmul.f32 %v1620_v59, %v635_v22  ;;  %v1632_v22 = vld [vmem:[%s2497_s3 + $0x190] sm:$0xff]  ;;  %v1610_v36 = vld [vmem:[%s2497_s3 + $0xe0] sm:$0xff]  ;;  %v1627_v59 = vld [vmem:[%s2497_s3 + $0x168] sm:$0xff] }
 0x161   : > { %v619_v44 = vadd.f32 %v615_v38, %v590_v40  ;;  %v1615_v38 = vld [vmem:[%s2497_s3 + $0x108] sm:$0xff] }
 0x162   : > { %v755_v39 = vpop.permute.xlu0 %754 }
 0x163   : > { %v2174_v7 = vpop.permute.xlu1 %572  ;;  %v648_v49 = vadd.f32 %v644_v45, %v619_v44  ;;  %v760_v14 = vmul.f32 %v1637_v5, %v755_v39 }
 0x164   : > { %v584_v41 = vmul.f32 %v1611_v30, %v2174_v7 }
 0x166   : > { %v751_v48 = vpop.permute.xlu0 %750  ;;  %v588_v50 = vadd.f32 %v584_v41, %v2168_v0 }
 0x167   : > { %v759_v52 = vmul.f32 %v1636_v28, %v751_v48 }
 0x168   : > { %v606_v13 = vpop.permute.xlu1 %605 }
 0x169   : > { %v614_v53 = vmul.f32 %v1616_v42, %v606_v13  ;;  %v1641_v13 = vld [vmem:[%s2497_s3 + $0x1d8] sm:$0xff] }
 0x16b   : > { %v2247_v2 = vpop.permute.xlu0 %713  ;;  %v618_v62 = vadd.f32 %v614_v53, %v589_v57  ;;  %v1644_v53 = vld [vmem:[%s2497_s3 + $0x1f0] sm:$0xff] }
 0x16d   : > { %v2188_v17 = vpop.permute.xlu1 %568  ;;  %v647_v15 = vadd.f32 %v643_v54, %v618_v62 }
 0x16e   : > { %v583_v47 = vmul.f32 %v1610_v36, %v2188_v17  ;;  %v1640_v17 = vld [vmem:[%s2497_s3 + $0x1d0] sm:$0xff] }
 0x170   : > { %v813_v26 = vpop.permute.xlu0 %812 }
 0x172   : > { %v2190_v56 = vpop.permute.xlu1 %601 }
 0x173   : > { %v613_v42 = vmul.f32 %v1615_v38, %v2190_v56  ;;  %v1614_v56 = vld [vmem:[%s2497_s3 + $0x100] sm:$0xff] }
 0x174   : > { %v809_v0 = vpop.permute.xlu0 %808 }
 0x175   : > { %v817_v54 = vmul.f32 %v1644_v53, %v809_v0 }
 0x177   : > { %v668_v20 = vpop.permute.xlu1 %667 }
 0x178   : > { %v673_v46 = vmul.f32 %v1625_v43, %v668_v20  ;;  %v1645_v20 = vld [vmem:[%s2497_s3 + $0x1f8] sm:$0xff] }
 0x179   : > { %v818_v37 = vmul.f32 %v1645_v20, %v813_v26  ;;  %v1626_v26 = vld [vmem:[%s2497_s3 + $0x160] sm:$0xff] }
 0x17a   : > { %v677_v9 = vadd.f32 %v673_v46, %v648_v49  ;;  %v554_v46 = vmul.f32 %v1606_v33, %v2186_v16 }
 0x17c   : > { %v2192_v23 = vpop.permute.xlu1 %630  ;;  %v706_v1 = vadd.f32 %v702_v55, %v677_v9  ;;  %v558_v16 = vadd.f32 %v554_v46, %v2163_v60  ;;  %v1618_v9 = vld [vmem:[%s2497_s3 + $0x120] sm:$0xff] }
 0x17d   : > { %v1634_v46 = vld [vmem:[%s2497_s3 + $0x1a0] sm:$0xff] }
 0x17e   : > { %v587_v57 = vadd.f32 %v583_v47, %v558_v16 }
 0x181   : > { %v664_v25 = vpop.permute.xlu1 %663 }
 0x182   : > { %v672_v6 = vmul.f32 %v1624_v61, %v664_v25 }
 0x184   : > { %v676_v63 = vadd.f32 %v672_v6, %v647_v15 }
 0x186   : > { %v2196_v27 = vpop.permute.xlu1 %626  ;;  %v705_v43 = vadd.f32 %v701_v35, %v676_v63 }
 0x187   : > { %v641_v6 = vmul.f32 %v1618_v9, %v2196_v27 }
 0x18b   : > { %v2198_v29 = vpop.permute.xlu1 %659 }
 0x190   : > { %v726_v31 = vpop.permute.xlu1 %725 }
 0x191   : > { %v731_v58 = vmul.f32 %v1633_v21, %v726_v31  ;;  %v1623_v21 = vld [vmem:[%s2497_s3 + $0x148] sm:$0xff] }
 0x192   : > { %v671_v61 = vmul.f32 %v1623_v21, %v2198_v29  ;;  %v1635_v29 = vld [vmem:[%s2497_s3 + $0x1a8] sm:$0xff] }
 0x193   : > { %v735_v11 = vadd.f32 %v731_v58, %v706_v1  ;;  %v617_v58 = vadd.f32 %v613_v42, %v588_v50 }
 0x195   : > { %v2220_v19 = vpop.permute.xlu1 %688  ;;  %v764_v31 = vadd.f32 %v760_v14, %v735_v11  ;;  %v1631_v11 = vld [vmem:[%s2497_s3 + $0x188] sm:$0xff] }
 0x196   : > { %v700_v14 = vmul.f32 %v1627_v59, %v2220_v19 }
 0x19a   : > { %v722_v3 = vpop.permute.xlu1 %721 }
 0x19b   : > { %v730_v39 = vmul.f32 %v1632_v22, %v722_v3  ;;  %v1619_v3 = vld [vmem:[%s2497_s3 + $0x128] sm:$0xff] }
 0x19c   : > { %v642_v60 = vmul.f32 %v1619_v3, %v2192_v23  ;;  %v612_v23 = vmul.f32 %v1614_v56, %v2194_v24  ;;  %v1622_v24 = vld [vmem:[%s2497_s3 + $0x140] sm:$0xff] }
 0x19d   : > { %v734_v49 = vadd.f32 %v730_v39, %v705_v43  ;;  %v670_v35 = vmul.f32 %v1622_v24, %v2212_v34  ;;  %v1643_v39 = vld [vmem:[%s2497_s3 + $0x1e8] sm:$0xff]  ;;  %v1630_v34 = vld [vmem:[%s2497_s3 + $0x180] sm:$0xff] }
 0x19e   : > { %v616_v20 = vadd.f32 %v612_v23, %v587_v57  ;;  %v728_v50 = vmul.f32 %v1630_v34, %v2247_v2 }
 0x19f   : > { %v2241_v51 = vpop.permute.xlu1 %684  ;;  %v763_v1 = vadd.f32 %v759_v52, %v734_v49 }
 0x1a0   : > { %v645_v63 = vadd.f32 %v641_v6, %v616_v20  ;;  %v699_v36 = vmul.f32 %v1626_v26, %v2241_v51 }
 0x1a2   : > { %v674_v41 = vadd.f32 %v670_v35, %v645_v63  ;;  %v862_v35 = vld [vmem:[%s2498_s4 + $0x18] sm:$0xff] }
 0x1a4   : > { %v2252_v4 = vpop.permute.xlu1 %717  ;;  %v703_v47 = vadd.f32 %v699_v36, %v674_v41 }
 0x1a5   : > { %v729_v22 = vmul.f32 %v1631_v11, %v2252_v4 }
 0x1a6   : > { %v732_v52 = vadd.f32 %v728_v50, %v703_v47 }
 0x1a9   : > { %v784_v25 = vpop.permute.xlu1 %783 }
 0x1aa   : > { %v789_v32 = vmul.f32 %v1641_v13, %v784_v25  ;;  %v646_v13 = vadd.f32 %v642_v60, %v617_v58  ;;  %v1642_v60 = vld [vmem:[%s2497_s3 + $0x1e0] sm:$0xff] }
 0x1ac   : > { %v793_v40 = vadd.f32 %v789_v32, %v764_v31  ;;  %v675_v27 = vadd.f32 %v671_v61, %v646_v13 }
 0x1ae   : > { %v2282_v44 = vadd.f32 %v818_v37, %v793_v40  ;;  %v747_v45 = vpop.permute.xlu1 %746  ;;  %v704_v31 = vadd.f32 %v700_v14, %v675_v27  ;;  %v1639_v37 = vld [vmem:[%s2497_s3 + $0x1c8] sm:$0xff]  ;;  %v805_v40 = vpop.permute.xlu0 %804 }
 0x1af   : > { %v758_v32 = vmul.f32 %v1635_v29, %v747_v45  ;;  %v816_v42 = vmul.f32 %v1643_v39, %v805_v40 }
 0x1b0   : > { %v826_v7 = vmul.f32 %v2282_v44, %v2282_v44  ;;  %v733_v4 = vadd.f32 %v729_v22, %v704_v31  ;;  %v860_v22 = vld [vmem:[%s2498_s4 + $0x8] sm:$0xff] }
 0x1b1   : > { %v892_v31 = vsel %vm887_vm1, %v860_v22, 0 }
 0x1b2   : > { %v830_v55 = vmul.f32 %v826_v7, %v2282_v44  ;;  %v762_v45 = vadd.f32 %v758_v32, %v733_v4  ;;  %v1638_v7 = vld [vmem:[%s2497_s3 + $0x1c0] sm:$0xff] }
 0x1b3   : > { %v780_v48 = vpop.permute.xlu1 %779 }
 0x1b4   : > { %v834_v62 = vmul.f32 0.044715, %v830_v55  ;;  %v788_v5 = vmul.f32 %v1640_v17, %v780_v48 }
 0x1b6   : > { %v838_v15 = vadd.f32 %v834_v62, %v2282_v44  ;;  %v792_v18 = vadd.f32 %v788_v5, %v763_v1 }
 0x1b8   : > { %v842_v19 = vmul.f32 0.7978846, %v838_v15  ;;  %v2335_v25 = vadd.f32 %v817_v54, %v792_v18  ;;  %v743_v30 = vpop.permute.xlu1 %742 }
 0x1b9   : > { %v757_v16 = vmul.f32 %v1634_v46, %v743_v30 }
 0x1ba   : > { %1863 = vtanh.f32 %v842_v19  ;;  %v825_v33 = vmul.f32 %v2335_v25, %v2335_v25  ;;  %v861_v19 = vld [vmem:[%s2498_s4 + $0x10] sm:$0xff] }
 0x1bb   : > { %v761_v9 = vadd.f32 %v757_v16, %v732_v52 }
 0x1bc   : > { %v829_v38 = vmul.f32 %v825_v33, %v2335_v25  ;;  %v895_v33 = vsel %vm887_vm1, %v861_v19, 0 }
 0x1bd   : > { %v776_v43 = vpop.permute.xlu1 %775  ;;  %v2394_v4 = vand.u32 4294901760, %v895_v33 }
 0x1be   : > { %v833_v51 = vmul.f32 0.044715, %v829_v38  ;;  %v787_v28 = vmul.f32 %v1639_v37, %v776_v43  ;;  %v2391_v37 = vand.u32 4294901760, %v892_v31  ;;  %v898_v38 = vsel %vm887_vm1, %v862_v35, 0 }
 0x1c0   : > { %v837_v3 = vadd.f32 %v833_v51, %v2335_v25  ;;  %v791_v49 = vadd.f32 %v787_v28, %v762_v45  ;;  %v2401_v34 = vsub.f32 %v892_v31, %v2391_v37  ;;  %v2403_v45 = vand.u32 4294901760, %v898_v38 }
 0x1c1   : > { %v772_v21 = vpop.permute.xlu1 %771  ;;  %v2406_v51 = vsub.f32 %v895_v33, %v2394_v4 }
 0x1c2   : > { %v841_v17 = vmul.f32 0.7978846, %v837_v3  ;;  %v820_v56 = vadd.f32 %v816_v42, %v791_v49  ;;  %v786_v53 = vmul.f32 %v1638_v7, %v772_v21  ;;  %v981_v3 = vand.u32 4294901760, %v2401_v34 }
 0x1c3   : > { %v2412_v49 = vsub.f32 %v898_v38, %v2403_v45  ;;  %v991_v50 = vand.u32 4294901760, %v2406_v51 }
 0x1c4   : > { %1865 = vtanh.f32 %v841_v17  ;;  %v824_v0 = vmul.f32 %v820_v56, %v820_v56  ;;  %v790_v59 = vadd.f32 %v786_v53, %v761_v9 }
 0x1c5   : > { %v1001_v52 = vand.u32 4294901760, %v2412_v49 }
 0x1c6   : > { %v828_v55 = vmul.f32 %v824_v0, %v820_v56  ;;  %v801_v57 = vpop.permute.xlu1 %800  ;;  %v992_v0 = vsub.f32 %v2406_v51, %v991_v50 }
 0x1c7   : > { %v1864_v58 = vpop.eup %1863  ;;  %v815_v48 = vmul.f32 %v1642_v60, %v801_v57 }
 0x1c8   : > { %v850_v61 = vadd.f32 1.0, %v1864_v58  ;;  %v832_v2 = vmul.f32 0.044715, %v828_v55  ;;  %v1002_v58 = vsub.f32 %v2412_v49, %v1001_v52 }
 0x1c9   : > { %v819_v62 = vadd.f32 %v815_v48, %v790_v59  ;;  %v993_v59 = vand.u32 4294901760, %v992_v0 }
 0x1ca   : > { %v854_v1 = vmul.f32 0.5, %v850_v61  ;;  %v836_v5 = vadd.f32 %v832_v2, %v820_v56  ;;  %v1003_v2 = vand.u32 4294901760, %v1002_v58 }
 0x1cb   : > { %v823_v23 = vmul.f32 %v819_v62, %v819_v62 }
 0x1cc   : > { %v858_v54 = vmul.f32 %v854_v1, %v2282_v44  ;;  %v840_v6 = vmul.f32 0.7978846, %v836_v5 }
 0x1cd   : > { %v827_v11 = vmul.f32 %v823_v23, %v819_v62 }
 0x1ce   : > { %v2363_v13 = vand.u32 4294901760, %v858_v54  ;;  %1867 = vtanh.f32 %v840_v6  ;;  %v870_v6 = vpop.permute.xlu0 %869 }
 0x1cf   : > { %v831_v14 = vmul.f32 0.044715, %v827_v11 }
 0x1d0   : > { %1698 = vmatprep.subr.mxu0 %v2363_v13  ;;  %v2367_v15 = vsub.f32 %v858_v54, %v2363_v13 }
 0x1d1   : > { %v1866_v18 = vpop.eup %1865  ;;  %v835_v20 = vadd.f32 %v831_v14, %v819_v62  ;;  %1699 = vmatpush3.msra.mxu0 %v2363_v13  ;;  %v875_v14 = vpop.permute.xlu1 %874 }
 0x1d2   : > { %v849_v29 = vadd.f32 1.0, %v1866_v18  ;;  %v2371_v24 = vand.u32 4294901760, %v2367_v15 }
 0x1d3   : > { %v839_v44 = vmul.f32 0.7978846, %v835_v20  ;;  %v885_v20 = vpop.permute.xlu0 %884 }
 0x1d4   : > { %v853_v27 = vmul.f32 0.5, %v849_v29  ;;  %v1037_v26 = vsub.f32 %v2367_v15, %v2371_v24 }
 0x1d5   : > { %1869 = vtanh.f32 %v839_v44  ;;  %v880_v22 = vpop.permute.xlu1 %879 }
 0x1d6   : > { %v857_v30 = vmul.f32 %v853_v27, %v2335_v25  ;;  %v1038_v63 = vand.u32 4294901760, %v1037_v26 }
 0x1d8   : > { %v2383_v32 = vand.u32 4294901760, %v857_v30  ;;  %1712 = vmatprep.subr.mxu1 %v1038_v63 }
 0x1d9   : > { %1713 = vmatpush3.msra.mxu1 %v1038_v63 }
 0x1da   : > { %1700 = vmatprep.subr.mxu0 %v2383_v32  ;;  %v1042_v36 = vsub.f32 %v857_v30, %v2383_v32 }
 0x1db   : > { %v1868_v25 = vpop.eup %1867  ;;  %1701 = vmatpush3.msra.mxu0 %v2383_v32 }
 0x1dc   : > { %v848_v39 = vadd.f32 1.0, %v1868_v25  ;;  %v2397_v40 = vand.u32 4294901760, %v1042_v36 }
 0x1de   : > { %v852_v41 = vmul.f32 0.5, %v848_v39  ;;  %v1044_v43 = vsub.f32 %v1042_v36, %v2397_v40 }
 0x1e0   : > { %v856_v46 = vmul.f32 %v852_v41, %v820_v56  ;;  %v1045_v28 = vand.u32 4294901760, %v1044_v43  ;;  %v982_v56 = vsub.f32 %v2401_v34, %v981_v3 }
 0x1e2   : > { %v1870_v47 = vpop.eup %1869  ;;  %v2408_v42 = vand.u32 4294901760, %v856_v46  ;;  %1714 = vmatprep.subr.mxu1 %v1045_v28  ;;  %v983_v57 = vand.u32 4294901760, %v982_v56 }
 0x1e3   : > { %v847_v7 = vadd.f32 1.0, %v1870_v47  ;;  %1715 = vmatpush3.msra.mxu1 %v1045_v28 }
 0x1e4   : > { %1702 = vmatprep.subr.mxu0 %v2408_v42  ;;  %v1049_v16 = vsub.f32 %v856_v46, %v2408_v42 }
 0x1e5   : > { %v851_v21 = vmul.f32 0.5, %v847_v7  ;;  %1703 = vmatpush3.msra.mxu0 %v2408_v42 }
 0x1e6   : > { %v1050_v17 = vand.u32 4294901760, %v1049_v16 }
 0x1e7   : > { %v855_v53 = vmul.f32 %v851_v21, %v819_v62 }
 0x1e8   : > { %v1051_v60 = vsub.f32 %v1049_v16, %v1050_v17 }
 0x1e9   : > { %v2425_v9 = vand.u32 4294901760, %v855_v53 }
 0x1ea   : > { %v1052_v55 = vand.u32 4294901760, %v1051_v60 }
 0x1eb   : > { %1704 = vmatprep.subr.mxu0 %v2425_v9  ;;  %v1056_v48 = vsub.f32 %v855_v53, %v2425_v9  ;;  %v1872_v53 = vld [vmem:[%s1964_s10] sm:$0xff] }
 0x1ec   : > { %1705 = vmatpush3.msra.mxu0 %v2425_v9  ;;  %1716 = vmatprep.subr.mxu1 %v1052_v55 }
 0x1ed   : > { %1717 = vmatpush3.msra.mxu1 %v1052_v55  ;;  %1726 = vmatprep.subr.mxu0 %v2367_v15  ;;  %v1057_v61 = vand.u32 4294901760, %v1056_v48  ;;  %v1873_v55 = vld [vmem:[%s1964_s10 + $0x18] sm:$0xff] }
 0x1ee   : > { %1707 = vmatmul.mubr.f32.vlgmr.msra.gmra.mxu0 %v983_v57 }
 0x1ef   : > { %1727 = vmatpush3.msra.mxu0 %v2367_v15  ;;  %1709 = vmatprep.mubr.f32.mxu0 %v993_v59  ;;  %v1058_v62 = vsub.f32 %v1056_v48, %v1057_v61  ;;  %v1874_v59 = vld [vmem:[%s1964_s10 + $0x10] sm:$0xff] }
 0x1f0   : > { %1728 = vmatprep.subr.mxu0 %v1042_v36 }
 0x1f1   : > { %1729 = vmatpush3.msra.mxu0 %v1042_v36  ;;  %v1059_v1 = vand.u32 4294901760, %v1058_v62 }
 0x1f2   : > { %1730 = vmatprep.subr.mxu0 %v1049_v16  ;;  %1710 = vmatmul.mubr.f32.gmra.mxu0 %v1003_v2 }
 0x1f3   : > { %1731 = vmatpush3.msra.mxu0 %v1049_v16  ;;  %1718 = vmatprep.subr.mxu1 %v1059_v1  ;;  %v1871_v16 = vld [vmem:[%s1964_s10 + $0x8] sm:$0xff] }
 0x1f4   : > { %1732 = vmatprep.subr.mxu0 %v1056_v48  ;;  %1719 = vmatpush3.msra.mxu1 %v1059_v1 }
 0x1f5   : > { %1733 = vmatpush3.msra.mxu0 %v1056_v48  ;;  %1721 = vmatmul.mubr.f32.vlgmr.msra.gmra.mxu1 %v2391_v37 }
 0x1f6   : > { %1734 = vmatprep.mubr.f32.mxu0 %v2179_v10  ;;  %1740 = vmatprep.subr.mxu1 %v2363_v13 }
 0x1f7   : > { %1754 = vmatprep.subr.mxu0 %v2371_v24  ;;  %1735 = vmatmul.mubr.f32.vlgmr.msra.gmra.mxu0 %v2401_v34 }
 0x1f8   : > { %1741 = vmatpush3.msra.mxu1 %v2363_v13  ;;  %1755 = vmatpush3.msra.mxu0 %v2371_v24 }
 0x1f9   : > { %1742 = vmatprep.subr.mxu1 %v2383_v32  ;;  %1756 = vmatprep.subr.mxu0 %v2397_v40 }
 0x1fa   : > { %1723 = vmatprep.mubr.f32.mxu1 %v2394_v4  ;;  %1743 = vmatpush3.msra.mxu1 %v2383_v32 }
 0x1fb   : > { %1757 = vmatpush3.msra.mxu0 %v2397_v40  ;;  %1724 = vmatmul.mubr.f32.gmra.mxu1 %v2403_v45 }
 0x1fc   : > { %1744 = vmatprep.subr.mxu1 %v2408_v42  ;;  %1758 = vmatprep.subr.mxu0 %v1050_v17 }
 0x1fd   : > { %1737 = vmatprep.mubr.f32.mxu0 %v2406_v51  ;;  %1745 = vmatpush3.msra.mxu1 %v2408_v42 }
 0x1fe   : > { %1759 = vmatpush3.msra.mxu0 %v1050_v17  ;;  %1746 = vmatprep.subr.mxu1 %v2425_v9 }
 0x1ff   : > { %1738 = vmatmul.mubr.f32.gmra.mxu0 %v2412_v49  ;;  %1760 = vmatprep.subr.mxu0 %v1057_v61 }
 0x200   : > { %1747 = vmatpush3.msra.mxu1 %v2425_v9  ;;  %1748 = vmatprep.mubr.f32.mxu1 %v971_v12 }
 0x201   : > { %1761 = vmatpush3.msra.mxu0 %v1057_v61  ;;  %1749 = vmatmul.mubr.f32.vlgmr.msra.gmra.mxu1 %v981_v3 }
 0x202   : > { %1768 = vmatprep.subr.mxu1 %v2363_v13  ;;  %1762 = vmatprep.mubr.f32.mxu0 %v2176_v8 }
 0x203   : > { %1769 = vmatpush3.msra.mxu1 %v2363_v13  ;;  %1763 = vmatmul.mubr.f32.vlgmr.msra.gmra.mxu0 %v2391_v37 }
 0x204   : > { %1770 = vmatprep.subr.mxu1 %v2383_v32  ;;  %1751 = vmatprep.mubr.f32.mxu1 %v991_v50 }
 0x205   : > { %1771 = vmatpush3.msra.mxu1 %v2383_v32  ;;  %1765 = vmatprep.mubr.f32.mxu0 %v2394_v4 }
 0x206   : > { %1752 = vmatmul.mubr.f32.gmra.mxu1 %v1001_v52  ;;  %1772 = vmatprep.subr.mxu1 %v2408_v42 }
 0x207   : > { %1773 = vmatpush3.msra.mxu1 %v2408_v42  ;;  %1766 = vmatmul.mubr.f32.gmra.mxu0 %v2403_v45 }
 0x208   : > { %1774 = vmatprep.subr.mxu1 %v2425_v9  ;;  %1776 = vmatprep.mubr.f32.mxu1 %v2176_v8 }
 0x209   : > { %1775 = vmatpush3.msra.mxu1 %v2425_v9 }
 0x20a   : > { %1777 = vmatmul.mubr.f32.vlgmr.msra.gmra.mxu1 %v2391_v37 }
 0x20b   : > { %1779 = vmatprep.mubr.f32.mxu1 %v2394_v4 }
 0x20e   : > { %1780 = vmatmul.mubr.f32.gmra.mxu1 %v2403_v45 }
 0x2ae   : > { %v1708_v10 = vpop.f32.mrf.mxu0 }
 0x2af   : > { %v986_v15 = vadd.f32 %v1708_v10, %v875_v14 }
 0x2b0   : > { %v975_v12 = vpop.f32.mrf.mxu0 }
 0x2b1   : > { %v976_v24 = vadd.f32 %v975_v12, %v870_v6 }
 0x2b2   : > { %v1711_v5 = vpop.f32.mrf.mxu0 }
 0x2b3   : > { %v1006_v27 = vadd.f32 %v1711_v5, %v885_v20 }
 0x2b4   : > { %v995_v23 = vpop.f32.mrf.mxu0 }
 0x2b5   : > { %v1722_v54 = vpop.f32.mrf.mxu1  ;;  %v996_v32 = vadd.f32 %v995_v23, %v880_v22 }
 0x2b6   : > { %v1103_v44 = vadd.f32 %v1722_v54, %v986_v15 }
 0x2b7   : > { %v1096_v11 = vpop.f32.mrf.mxu1  ;;  %v1736_v13 = vpop.f32.mrf.mxu0 }
 0x2b8   : > { %v1097_v19 = vadd.f32 %v1096_v11, %v976_v24  ;;  %v1202_v31 = vadd.f32 %v1736_v13, %v1103_v44 }
 0x2b9   : > { %v1194_v8 = vpop.f32.mrf.mxu0 }
 0x2ba   : > { %v1195_v37 = vadd.f32 %v1194_v8, %v1097_v19 }
 0x2bb   : > { %v1725_v18 = vpop.f32.mrf.mxu1 }
 0x2bc   : > { %v1115_v33 = vadd.f32 %v1725_v18, %v1006_v27 }
 0x2bd   : > { %v1108_v29 = vpop.f32.mrf.mxu1 }
 0x2be   : > { %v1109_v25 = vadd.f32 %v1108_v29, %v996_v32 }
 0x2bf   : > { %v1739_v26 = vpop.f32.mrf.mxu0 }
 0x2c0   : > { %v1216_v40 = vadd.f32 %v1739_v26, %v1115_v33 }
 0x2c1   : > { %v1208_v30 = vpop.f32.mrf.mxu0  ;;  %v1750_v63 = vpop.f32.mrf.mxu1 }
 0x2c2   : > { %v1301_v4 = vadd.f32 %v1750_v63, %v1202_v31  ;;  %v1209_v45 = vadd.f32 %v1208_v30, %v1109_v25 }
 0x2c3   : > { %v1292_v35 = vpop.f32.mrf.mxu1  ;;  %v1764_v36 = vpop.f32.mrf.mxu0 }
 0x2c4   : > { %v1293_v41 = vadd.f32 %v1292_v35, %v1195_v37  ;;  %v1406_v51 = vadd.f32 %v1764_v36, %v1301_v4 }
 0x2c5   : > { %v1399_v38 = vpop.f32.mrf.mxu0 }
 0x2c6   : > { %v1753_v39 = vpop.f32.mrf.mxu1  ;;  %v1400_v47 = vadd.f32 %v1399_v38, %v1293_v41 }
 0x2c7   : > { %v1767_v34 = vpop.f32.mrf.mxu0  ;;  %v1317_v46 = vadd.f32 %v1753_v39, %v1216_v40 }
 0x2c8   : > { %v1308_v43 = vpop.f32.mrf.mxu1 }
 0x2c9   : > { %v1309_v42 = vadd.f32 %v1308_v43, %v1209_v45  ;;  %v1411_v49 = vpop.f32.mrf.mxu0  ;;  %v1418_v50 = vadd.f32 %v1767_v34, %v1317_v46 }
 0x2ca   : > { %v1778_v28 = vpop.f32.mrf.mxu1 }
 0x2cb   : > { %v1499_v3 = vadd.f32 %v1778_v28, %v1406_v51  ;;  %v1412_v52 = vadd.f32 %v1411_v49, %v1309_v42 }
 0x2cc   : > { %v1492_v7 = vpop.f32.mrf.mxu1 }
 0x2cd   : > { %v1515_v21 = vadd.f32 %v1871_v16, %v1499_v3  ;;  %v1493_v17 = vadd.f32 %v1492_v7, %v1400_v47 }
 0x2ce   : > { %v1781_v56 = vpop.f32.mrf.mxu1 }
 0x2cf   : > { %1519 = vst.msk [vmem:[%s251_s27 + $0x8] sm:$0xff] %vm256_vm0, %v1515_v21  ;;  %v1514_v0 = vadd.f32 %v1872_v53, %v1493_v17  ;;  %v1511_v60 = vadd.f32 %v1781_v56, %v1418_v50 }
 0x2d0   : > { %v1504_v9 = vpop.f32.mrf.mxu1 }
 0x2d1   : > { %1518 = vst.msk [vmem:[%s251_s27] sm:$0xff] %vm256_vm0, %v1514_v0  ;;  %v1517_v57 = vadd.f32 %v1873_v55, %v1511_v60  ;;  %v1505_v58 = vadd.f32 %v1504_v9, %v1412_v52 }
 0x2d3   : > { %1521 = vst.msk [vmem:[%s251_s27 + $0x18] sm:$0xff] %vm256_vm0, %v1517_v57  ;;  %v1516_v48 = vadd.f32 %v1874_v59, %v1505_v58 }
 0x2d5   : > { %1520 = vst.msk [vmem:[%s251_s27 + $0x10] sm:$0xff] %vm256_vm0, %v1516_v48 }
 0x2d6 PF: > { %s16_s21 = sadd.s32 1, %s1881_s21  }
 0x2d7   : > { %p13_p4 = scmp.ge.s32.totalorder %s16_s21, 4  }
 0x2d9   :  { %15 = sbr.rel (!%p13_p4) target bundleno = 1 (0x1), region = 89 }

</bundles_post_ra>
